<compile_context>
chip_gen: v7x
topology: tpu7x:2x2x1
jax: 0.10.0
libtpu: 0.0.40
codegen_flags: <defaults>
</compile_context>

<pallas_src>
import functools

import jax
import jax.numpy as jnp
from jax import lax
from jax.experimental import pallas as pl
from jax.experimental.pallas import tpu as pltpu

_LANE = 128


def _persistance_kernel(x_ref, m_ref, o_ref, *, upcast, precision):
    """out[r, w*T + t] = x[r, w] via a one-hot expansion matmul on the MXU.

    x_ref: (tr, W)   m_ref: (W, tn)   o_ref: (tr, tn)
    """
    x = x_ref[...]
    if upcast:
        x = x.astype(jnp.float32)
    out = jnp.dot(x, m_ref[...],
                  preferred_element_type=jnp.float32,
                  precision=precision)
    o_ref[...] = out.astype(o_ref.dtype)


def _cdiv(a, b):
    return -(-a // b)


def _vmem_capacity_bytes():
    try:
        cap = getattr(pltpu.get_tpu_info(), "vmem_capacity_bytes", None)
        if cap:
            return int(cap)
    except Exception:
        pass
    return 64 * 1024 * 1024  # conservative default (v7x per-TC physical VMEM)


def _pick_tn(WT, cap_cols):
    """Lane chunk of the flat output; prefer 128-multiple divisors of WT."""
    if WT <= cap_cols or WT % _LANE != 0:
        return WT
    t = (cap_cols // _LANE) * _LANE
    while t >= _LANE:
        if WT % t == 0:
            return t
        t -= _LANE
    return _LANE


def _pick_tr(R, W, tn, itemsize, m_itemsize, sub, budget_bytes):
    """Rows per block so 2x in + 2x out + f32 intermediate + 2x M fit budget."""
    m_bytes = 2 * W * tn * m_itemsize
    row_budget = max(budget_bytes - m_bytes, budget_bytes // 4)
    per_row = tn * (2 * itemsize + 4) + 2 * W * itemsize
    tr = max(sub, (row_budget // per_row) // sub * sub)
    if tr >= R:
        return R
    t = tr
    while t >= sub:            # prefer a divisor of R (no boundary masking)
        if R % t == 0:
            return t
        t -= sub
    return tr                  # fall back: Pallas masks the tail block


def persistance_forward(x, grid_arr, time_steps_out, *,
                        min_pallas_out_bytes=1 << 20):
    """x: (B, H, W, 1). grid_arr is unused (matches the PyTorch module)."""
    del grid_arr
    B, H, W, C = x.shape
    assert C == 1, "Give only one past example to persistance model"
    T = int(time_steps_out)

    itemsize = jnp.dtype(x.dtype).itemsize
    out_bytes = B * H * W * T * itemsize

    # Small-problem fast path: launch + pipeline overhead dominates there.
    if out_bytes < min_pallas_out_bytes:
        return jnp.broadcast_to(x, (B, H, W, T))

    R = B * H
    WT = W * T
    x2 = x.reshape(R, W)                 # contiguous, free

    # Precision gating: bf16 0/1 matrix at DEFAULT is exact (single 1.0 term,
    # f32 accumulation); other dtypes take the f32 HIGHEST pass-through path.
    if x.dtype == jnp.bfloat16:
        m_dtype, precision, upcast = jnp.bfloat16, lax.Precision.DEFAULT, False
    else:
        m_dtype, precision, upcast = jnp.float32, lax.Precision.HIGHEST, True
    m_itemsize = jnp.dtype(m_dtype).itemsize

    # One-hot expansion matrix, built once in the wrapper (hoisted out of the
    # kernel), division-free:  M[w, j] = 1  iff  w*T <= j < (w+1)*T.
    col = jnp.arange(WT, dtype=jnp.int32)[None, :]
    row = jnp.arange(W, dtype=jnp.int32)[:, None]
    m = ((col >= row * T) & (col < (row + 1) * T)).astype(m_dtype)

    # Generation-aware block sizing.
    vmem_cap = _vmem_capacity_bytes()
    budget = vmem_cap // 3               # ~14 MiB out-block on 128 MiB chips,
    sub = max(8, 32 // itemsize)         # ~7 MiB on v7x (64 MiB VMEM)
    tn = _pick_tn(WT, 4096)
    tr = _pick_tr(R, W, tn, itemsize, m_itemsize, sub, budget)

    # Give v7x's two TensorCores enough parallel grid steps even for small R.
    n_r, n_n = _cdiv(R, tr), _cdiv(WT, tn)
    while n_r * n_n < 4 and tr % sub == 0 and tr >= 2 * sub:
        tr = (tr // 2) // sub * sub
        n_r = _cdiv(R, tr)

    footprint = (2 * tr * W * itemsize          # input double buffer
                 + 2 * W * tn * m_itemsize      # expansion-matrix buffers
                 + 2 * tr * tn * itemsize       # output double buffer
                 + tr * tn * 4)                 # f32 matmul intermediate
    vmem_limit = int(min(0.85 * vmem_cap,
                         max(2 * footprint + (4 << 20), 32 << 20)))

    out_flat = pl.pallas_call(
        functools.partial(_persistance_kernel,
                          upcast=upcast, precision=precision),
        out_shape=jax.ShapeDtypeStruct((R, WT), x.dtype),
        grid_spec=pltpu.PrefetchScalarGridSpec(
            num_scalar_prefetch=0,
            grid=(n_r, n_n),
            in_specs=[
                pl.BlockSpec((tr, W), lambda r, n: (r, 0)),
                pl.BlockSpec((W, tn), lambda r, n: (0, n)),  # fetched once
            ],
            out_specs=pl.BlockSpec((tr, tn), lambda r, n: (r, n)),
        ),
        compiler_params=pltpu.CompilerParams(
            dimension_semantics=("parallel", "parallel"),
            vmem_limit_bytes=vmem_limit,
        ),
        cost_estimate=pl.CostEstimate(
            flops=0, transcendentals=0,
            bytes_accessed=(R * W * itemsize
                            + W * WT * m_itemsize
                            + R * WT * itemsize)),
    )(x2, m)

    # (R, W*T) -> (B, H, W, T): contiguous, free reshape.
    return out_flat.reshape(B, H, W, T)


class PersistanceModel:
    """JAX/Pallas port of models/persistance.py::PersistanceModel.

    No learnable parameters (the PyTorch __init__ only stores TIME_STEPS_OUT).
    """

    def __init__(self, config: dict, img_size: tuple, *,
                 min_pallas_out_bytes: int = 1 << 20):
        self.time_steps_out = config["TIME_STEPS_OUT"]
        self.min_pallas_out_bytes = min_pallas_out_bytes

    def __call__(self, x, grid):
        return persistance_forward(
            x, grid, self.time_steps_out,
            min_pallas_out_bytes=self.min_pallas_out_bytes)


if __name__ == "__main__":
    key = jax.random.PRNGKey(0)
    B, H, W, C = 2, 16, 16, 1
    T = 8  # TIME_STEPS_OUT

    kx, kg = jax.random.split(key)
    x = jax.random.normal(kx, (B, H, W, C), dtype=jnp.float32)
    grid = jax.random.normal(kg, (B, H, W, 2), dtype=jnp.float32)  # unused

    # Pallas path (threshold 0 so this small demo exercises the kernel).
    model = PersistanceModel({"TIME_STEPS_OUT": T}, img_size=(H, W),
                             min_pallas_out_bytes=0)
    out = jax.block_until_ready(model(x, grid))
    ref = jnp.broadcast_to(x, (B, H, W, T))
    assert out.shape == (B, H, W, T), out.shape
    assert jnp.allclose(out, ref), "f32 kernel mismatch vs reference"

    # bf16 input -> DEFAULT-precision MXU path.
    xb = x.astype(jnp.bfloat16)
    outb = jax.block_until_ready(
        persistance_forward(xb, grid, T, min_pallas_out_bytes=0))
    refb = jnp.broadcast_to(xb, (B, H, W, T))
    assert jnp.allclose(outb.astype(jnp.float32), refb.astype(jnp.float32)), \
        "bf16 kernel mismatch vs reference"

    # W*T not a multiple of 128 (masked-store path).
    out5 = jax.block_until_ready(
        persistance_forward(x, grid, 5, min_pallas_out_bytes=0))
    assert jnp.allclose(out5, jnp.broadcast_to(x, (B, H, W, 5))), \
        "non-128-aligned W*T mismatch"

    # Small-problem fast path (default threshold skips pallas_call).
    out_fast = jax.block_until_ready(persistance_forward(x, grid, T))
    assert jnp.allclose(out_fast, ref), "fast-path mismatch"

    print("KERNEL_OK")
</pallas_src>

<mosaic_0001>
module attributes {stable_mosaic.version = 11 : i64} {
  func.func @_persistance_kernel(%arg0: i32, %arg1: i32, %arg2: memref<8x16xf32, #tpu.memory_space<vmem>>, %arg3: memref<16x128xf32, #tpu.memory_space<vmem>>, %arg4: memref<8x128xf32, #tpu.memory_space<vmem>>) attributes {dimension_semantics = [#tpu.dimension_semantics<parallel>, #tpu.dimension_semantics<parallel>], iteration_bounds = array<i64: 4, 1>, scalar_prefetch = 0 : i64, scratch_operands = 0 : i64, tpu.core_type = #tpu.core_type<tc>, window_params = [{transform_indices = @transform_0, window_bounds = array<i64: 8, 16>}, {transform_indices = @transform_1, window_bounds = array<i64: 16, 128>}, {transform_indices = @transform_2, window_bounds = array<i64: 8, 128>}]} {
    %c0 = arith.constant 0 : index
    %c0_0 = arith.constant 0 : index
    %0 = vector.load %arg2[%c0, %c0_0] : memref<8x16xf32, #tpu.memory_space<vmem>>, vector<8x16xf32>
    %c0_1 = arith.constant 0 : index
    %c0_2 = arith.constant 0 : index
    %1 = vector.load %arg3[%c0_1, %c0_2] : memref<16x128xf32, #tpu.memory_space<vmem>>, vector<16x128xf32>
    %cst = arith.constant dense<0.000000e+00> : vector<8x128xf32>
    %2 = tpu.matmul %0, %1, %cst {dimension_numbers = #tpu.dot_dimension_numbers<[1], [0], [0], [1], [0, 0, 1, 1], [], []>, precision = #tpu.contract_precision<fp32>} : vector<8x16xf32>, vector<16x128xf32>, vector<8x128xf32> -> vector<8x128xf32>
    %c0_3 = arith.constant 0 : index
    %c0_4 = arith.constant 0 : index
    %3 = vector.load %arg4[%c0_3, %c0_4] : memref<8x128xf32, #tpu.memory_space<vmem>>, vector<8x128xf32>
    tpu.vector_store %arg4[%c0_3, %c0_4], %2 {strides = array<i32>} : memref<8x128xf32, #tpu.memory_space<vmem>>, vector<8x128xf32>,
    return
  }
  func.func @transform_0(%arg0: i32, %arg1: i32) -> (i32, i32) {
    %c0_i32 = arith.constant 0 : i32
    %c0_i32_0 = arith.constant 0 : i32
    return %arg0, %c0_i32 : i32, i32
  }
  func.func @transform_1(%arg0: i32, %arg1: i32) -> (i32, i32) {
    %c0_i32 = arith.constant 0 : i32
    %c0_i32_0 = arith.constant 0 : i32
    return %c0_i32, %arg1 : i32, i32
  }
  func.func @transform_2(%arg0: i32, %arg1: i32) -> (i32, i32) {
    %c0_i32 = arith.constant 0 : i32
    return %arg0, %arg1 : i32, i32
  }
}

</mosaic_0001>

<bundles_post_ra>
// kernel: tpu_custom_call.1
= control target key start
LH: loop header
LB: loop body
LE: loop exit
PB: predicated region body
PF: predicated region fallthrough
CT: control target
= control target key end

     0   :  { %7 = vsyncpa [#allocation3], 0  ;;  %s1115_s0 = inlined_call_operand.vmem [shape: f32[32,16], index: 0, kind: input, shape index: {}]   ;;  %s1116_s1 = inlined_call_operand.vmem [shape: f32[16,128], index: 1, kind: input, shape index: {}]   ;;  %s1117_s2 = inlined_call_operand.hbm [shape: f32[32,128], index: 2, kind: output, shape index: {}]  }
   0x1   :  { %9 = vsyncpa [#allocation3 + $0x1], 0  ;;  %s991_s9 = smov 0   ;;  %s993_s10 = smov 0  }
   0x2   :  { %s995_s11 = smov 0   ;;  %s997_s12 = smov 0  }
   0x3   :  { %s999_s13 = smov 0   ;;  %s1001_s14 = smov 0  }
   0x4 LB: > { %s735_s15 = sadd.s32 4294967295, %s970_s14   ;;  %s736_s16 = sadd.s32 4294967294, %s970_s14   ;;  %s970_s14 = sphi %s1001_s14, %s15_s14   ;;  %s966_s13 = sphi %s999_s13, %s1124_s13   ;;  %s962_s12 = sphi %s997_s12, %s1123_s12   ;;  %s958_s11 = sphi %s995_s11, %s1122_s11   ;;  %s954_s10 = sphi %s993_s10, %s1121_s10   ;;  %s950_s9 = sphi %s991_s9, %s1120_s9  }
   0x5   : > { %s27_s17 = sadd.s32 1, %s966_s13  ;;  %s88_s18 = sadd.s32 1, %s958_s11 }
   0x6   : > { %p29_p0 = scmp.ge.s32.totalorder %s27_s17, 4  ;;  %p98_p1 = scmp.ne.s32.totalorder %s958_s11, %s954_s10 }
   0x7   : > { %p99_p2 = scmp.eq.s32.totalorder %s735_s15, 3  ;;  %p104_p3 = scmp.ne.s32.totalorder %s954_s10, %s950_s9 }
   0x8   : > { %s1126_s17 = smov (%p29_p0, %s27_s17), 0  ;;  %p105_p5 = scmp.eq.s32.totalorder %s736_s16, 3 }
   0x9   : > { %p1031_p4 = por %p99_p2, %p98_p1  ;;  %s83_s20 = ssub.s32 %s966_s13, %s1126_s17 }
   0xa   : > { %p740_p6 = scmp.ge.s32.totalorder %s970_s14, 1  ;;  %p86_p7 = scmp.eq.s32.totalorder %s83_s20, 0 }
   0xb   : > { %p1038_p8 = por %p105_p5, %p104_p3  ;;  %p137_p9 = scmp.lt.s32.totalorder %s970_s14, 5 }
   0xc   : > { %s1044_s22 = scalar_select %p86_p7, %s958_s11, %s88_s18  }
   0xd   : > { %p138_p10 = pnand %p740_p6, %p137_p9 }
   0xe   : > { %v171_v0 = vld [vmem:[%s1116_s1] sm:$0xff] (!%p138_p10)  ;;  %v172_v1 = vld [vmem:[%s1116_s1 + $0x8] sm:$0xff] (!%p138_p10)  ;;  %p162_p11 = scmp.lt.s32.totalorder (!%p138_p10), %s962_s12, 3  ;;  %v972_v2 = vmov (!%p138_p10), 0.0|0.0   ;;  %vm973_vm0 = vmmov (!%p138_p10), 0   ;;  %v974_v5 = vmov (!%p138_p10), 0.0  }
   0xf   : > { %141 = sbr.rel (%p138_p10) target bundleno = 282 (0x11a), region = 28  ;;  %816 = vmatprep.subr.bf16.mxu0 (!%p138_p10), %v972_v2  ;;  %v178_v3 = vand.u32 (!%p138_p10), 4294901760, %v171_v0  ;;  %v181_v4 = vand.u32 (!%p138_p10), 4294901760, %v172_v1  ;;  %807 = vmatprep.subr.bf16.mxu1 (!%p138_p10), %v972_v2  ;;  %vm173_vm1 = vcmask (!%p138_p10), 130048   ;;  %s159_s4 = sand.u32 (!%p138_p10), 1, %s954_s10  }
  0x10   : > { %790 = vmatprep.mubr.msk.f32.mxu0 (!%p138_p10), %vm973_vm0, %v974_v5  ;;  %769 = vmatprep.mubr.msk.f32.mxu1 (!%p138_p10), %vm973_vm0, %v974_v5  ;;  %s741_s5 = sshll.u32 (!%p138_p10), %s159_s4, 3  ;;  %s744_s6 = sshll.u32 (!%p138_p10), %s962_s12, 7 }
  0x11   : > { %v808_v6 = vpack.c.bf16 (!%p138_p10), %v181_v4, %v178_v3  ;;  %v256_v7 = vsub.f32 (!%p138_p10), %v171_v0, %v178_v3  ;;  %v263_v8 = vsub.f32 (!%p138_p10), %v172_v1, %v181_v4  ;;  %s161_s7 = scalar_lea.vmem (!%p138_p10), [#allocation2], %s741_s5  ;;  %s1068_s18 = scalar_lea.hbm (!%p138_p10), %s1117_s2, %s744_s6 }
  0x12   : > { %s652_s8 = sshll.u32 (!%p138_p10), %s161_s7, 4  ;;  %s638_s20 = scalar_lea.sflag (!%p138_p10), [#allocation3], %s159_s4  ;;  %s1070_s8 = int_to_ptr.vmem [resolvable:$true] %s652_s8 }
  0x13   : > { %818 = vmatpush3.bf16.msra.mxu0 (!%p138_p10), %v808_v6  ;;  %809 = vmatpush3.bf16.msra.mxu1 (!%p138_p10), %v808_v6  ;;  %v257_v9 = vand.u32 (!%p138_p10), 4294901760, %v256_v7  ;;  %v264_v10 = vand.u32 (!%p138_p10), 4294901760, %v263_v8  ;;  %v814_v24 = vpack.c.bf16 (!%p138_p10), %v263_v8, %v256_v7  ;;  %s892_s23 = scalar_lea.vmem (!%p138_p10), %s1070_s8, 128 }
  0x14   : > { %810 = vmatprep.subr.bf16.mxu1 (!%p138_p10), %v972_v2  ;;  %819 = vmatprep.subr.bf16.mxu0 (!%p138_p10), %v972_v2  ;;  %p893_p12 = scmp.ne.s32.totalorder (!%p138_p10), %s1070_s8, %s892_s23 }
  0x15   : > { %v258_v13 = vsub.f32 (!%p138_p10), %v256_v7, %v257_v9  ;;  %v265_v14 = vsub.f32 (!%p138_p10), %v263_v8, %v264_v10  ;;  %v820_v19 = vpack.c.bf16 (!%p138_p10), %v264_v10, %v257_v9 }
  0x16   : > { %s163_s27 = scalar_select %p162_p11, %s962_s12, 3 }
  0x17   : > { %v259_v17 = vand.u32 4294901760, %v258_v13  ;;  %v266_v18 = vand.u32 4294901760, %v265_v14  ;;  %p894_p13 = pnand %p893_p12, %p1031_p4  ;;  %s975_s12 = smov [#allocation2]  }
  0x18   : > { %s742_s28 = sshll.u32 %s163_s27, 3  ;;  %s896_s24 = sshll.u32 %s975_s12, 4  ;;  %s897_s24 = int_to_ptr.vmem [resolvable:$false] %s896_s24 }
  0x19   : > { %s165_s3 = scalar_lea.vmem %s1115_s0, %s742_s28  ;;  %v811_v22 = vpack.c.bf16 %v266_v18, %v259_v17  ;;  %p895_p0 = pneg %p894_p13 }
  0x1a   : > { %v170_v11 = vld [vmem:[%s165_s3] sm:$0xff]  ;;  %s898_s25 = scalar_lea.vmem %s897_s24, 256  ;;  %p899_p1 = scmp.lt.s32.totalorder %s1070_s8, %s897_s24 }
  0x1b   : > { %v175_v12 = vsel %vm173_vm1, %v170_v11, 0  ;;  %p900_p2 = scmp.lt.s32.totalorder %s898_s25, %s892_s23 }
  0x1c   : > { %v244_v15 = vand.u32 4294901760, %v175_v12 }
  0x1d   : > { %p901_p3 = por %p900_p2, %p899_p1 }
  0x1e   : > { %v245_v16 = vsub.f32 %v175_v12, %v244_v15 }
  0x1f   : > { %p902_p5 = pnand %p901_p3, %p895_p0 }
  0x20   : > { %v246_v20 = vand.u32 4294901760, %v245_v16 }
  0x22   : > { %791 = vmatmul.mubr.f32.vlgmr.msra.gmra.mrb[0].mxu0 %v246_v20  ;;  %v247_v21 = vsub.f32 %v245_v16, %v246_v20 }
  0x23   : > { %821 = vmatpush3.bf16.msra.mxu0 %v820_v19  ;;  %797 = vmatprep.mubr.msk.f32.mxu0 %vm973_vm0, %v974_v5 }
  0x24   : > { %v248_v23 = vand.u32 4294901760, %v247_v21  ;;  %822 = vmatprep.subr.bf16.mxu0 %v972_v2 }
  0x26   : > { %770 = vmatmul.mubr.f32.vlgmr.msra.gmra.mrb[0].mxu1 %v248_v23 }
  0x27   : > { %812 = vmatpush3.bf16.msra.mxu1 %v811_v22  ;;  %776 = vmatprep.mubr.msk.f32.mxu1 %vm973_vm0, %v974_v5 }
  0x28   : > { %813 = vmatprep.subr.bf16.mxu1 %v972_v2 }
  0x2a   : > { %798 = vmatmul.mubr.f32.vlgmr.msra.gmra.mrb[0].mxu0 %v244_v15 }
  0x2b   : > { %824 = vmatpush3.bf16.msra.mxu0 %v808_v6  ;;  %804 = vmatprep.mubr.msk.f32.mxu0 %vm973_vm0, %v974_v5 }
  0x2e   : > { %777 = vmatmul.mubr.f32.vlgmr.msra.gmra.mrb[0].mxu1 %v244_v15 }
  0x2f   : > { %815 = vmatpush3.bf16.msra.mxu1 %v814_v24  ;;  %783 = vmatprep.mubr.msk.f32.mxu1 %vm973_vm0, %v974_v5 }
  0x32   : > { %805 = vmatmul.mubr.f32.vlgmr.msra.gmra.mrb[0].mxu0 %v244_v15 }
  0x36   : > { %784 = vmatmul.mubr.f32.vlgmr.msra.gmra.mrb[0].mxu1 %v245_v16 }
 0x105   : > { %v632_v25 = vpop.f32.mrb[0].mxu0 }
 0x106   : > { %v806_v26 = vpop.f32.mrb[1].mxu0 }
 0x109   : > { %v407_v27 = vpop.f32.mrb[0].mxu1 }
 0x10a   : > { %v825_v28 = vadd.f32 %v632_v25, %v407_v27  ;;  %v785_v29 = vpop.f32.mrb[1].mxu1 }
 0x10c   : > { %636 = vst [vmem:[%s161_s7] sm:$0xff] %v825_v28 }
 0x10d   : > { %905 = shalt.err (!%p902_p5)
}
 0x10e   : > { %s906_s26 = scalar_lea.hbm %s1068_s18, 128  ;;  %s910_s29 = scalar_lea.hbm %s1117_s2, 512 }
 0x10f   : > { %p907_p6 = scmp.ne.s32.totalorder %s1068_s18, %s906_s26  ;;  %p911_p10 = scmp.lt.u32.totalorder %s1068_s18, %s1117_s2 }
 0x110   : > { %p912_p11 = scmp.lt.u32.totalorder %s910_s29, %s906_s26  ;;  %p914_p13 = scmp.lt.u32.totalorder %s906_s26, %s1068_s18 }
 0x111   : > { %p908_p7 = pnand %p907_p6, %p1031_p4 }
 0x112   : > { %p913_p12 = por %p912_p11, %p911_p10 }
 0x113   : > { %p909_p9 = pneg %p908_p7 }
 0x114   : > { %p915_p0 = por %p914_p13, %p913_p12 }
 0x116   : > { %p916_p1 = pnand %p915_p0, %p909_p9 }
 0x118   : > { %919 = shalt.err (!%p916_p1)
}
 0x119   : > { %834 = dma.vmem_to_hbm [thread:$0]  (%p1031_p4), %s1070_s8, 128, %s1068_s18, %s638_s20  }
 0x11a PF: > { %p840_p2 = scmp.ge.s32.totalorder %s970_s14, 2  ;;  %s664_s4 = sand.u32 1, %s950_s9  }
 0x11b   : > { %s665_s5 = scalar_lea.sflag [#allocation3], %s664_s4 }
 0x11c   : > { %p837_p3 = pnand %p840_p2, %p1038_p8 }
 0x11e   : > { %945 = dma.done.wait (!%p837_p3), %s665_s5, 128  }
 0x11f   : > { %947 = vsyncadd (!%p837_p3), %s665_s5, 4294967168  ;;  %s15_s14 = sadd.s32 1, %s970_s14   ;;  %s1120_s9 = smov %s954_s10 }
 0x120   : > { %p12_p5 = scmp.ge.s32.totalorder %s15_s14, 6   ;;  %s1121_s10 = smov %s958_s11 }
 0x121   : > { %s1122_s11 = smov %s1044_s22  ;;  %s1123_s12 = smov %s966_s13 }
 0x122   : > { %s1124_s13 = smov %s1126_s17  ;;  %14 = sbr.rel (!%p12_p5) target bundleno = 4 (0x4), region = 66 }
 0x129   :  { %670 = vsyncpa [#allocation3], 1 }
 0x12a   :  { %672 = vsyncpa [#allocation3 + $0x1], 1 }

</bundles_post_ra>
